<compile_context>
chip_gen: v7x
topology: tpu7x:2x2x1
jax: 0.10.0
libtpu: 0.0.40
codegen_flags: <defaults>
</compile_context>

<pallas_src>
import functools
import math

import jax
import jax.numpy as jnp
from jax.experimental import pallas as pl
from jax.experimental.pallas import tpu as pltpu

_INV_LN10 = 1.0 / math.log(10.0)
_LANE_PACK_MAX_C = 64                       # unroll-over-channels threshold
_DEFAULT_BLOCK_BYTES = 4 * 1024 * 1024      # ~4 MiB f32 working set per grid step
_DEFAULT_VMEM_LIMIT = 48 * 1024 * 1024      # < v7x 64 MiB physical; fine on v5e/v6e


def _pooled_max_and_sum(x, length):
    """Per-row max and sum of the k=2 / s=1 pad-same average pool of x.

    x: (..., length) f32 with the spectrum on the lane (last) axis.
    spec[i] = 0.5 * (x[i] + x[i+1]) with x[length] := 0 (one zero padded right).
    Returns (max(spec), sum(spec)), each shaped (..., 1).
    """
    axis = x.ndim - 1
    # Left-shift by one lane: pltpu.roll follows jnp.roll semantics, and a
    # positive shift of length-1 is equivalent to -1; zero the wrapped lane.
    lane = jax.lax.broadcasted_iota(jnp.int32, x.shape, axis)
    x_next = jnp.where(lane == length - 1, 0.0,
                       pltpu.roll(x, shift=length - 1, axis=axis))
    pooled_max = 0.5 * jnp.max(x + x_next, axis=-1, keepdims=True)
    # Exact identity: sum(spec) = sum(x) - 0.5 * x[..., 0]; no shifted tensor
    # is needed on the sum path.
    pooled_sum = jnp.sum(x, axis=-1, keepdims=True) - 0.5 * x[..., :1]
    return pooled_max, pooled_sum


def _snr_kernel_lane_packed(x_ref, out_ref, *, num_channels, length):
    """Small-C path.  x_ref: (TB, C*L) — one batch row per sublane (dense),
    channels concatenated along lanes.  out_ref: (TB, C) attention weights."""
    cols = []
    for c in range(num_channels):                      # static unroll, C is small
        xc = x_ref[:, pl.ds(c * length, length)].astype(jnp.float32)   # (TB, L)
        mx, sm = _pooled_max_and_sum(xc, length)                        # (TB, 1)
        cols.append(jnp.log(mx / sm))
    snr = jnp.concatenate(cols, axis=1) * _INV_LN10    # (TB, C), channels on lanes
    # Softmax over channels (lane axis), numerically stabilized.
    m = jnp.max(snr, axis=1, keepdims=True)
    e = jnp.exp(snr - m)
    out_ref[...] = (e / jnp.sum(e, axis=1, keepdims=True)).astype(out_ref.dtype)


def _snr_kernel_channels_sublane(x_ref, out_ref, *, length):
    """Large-C path.  x_ref: (TB, C, L) with channels on sublanes (dense for
    C a multiple of 8).  out_ref: (TB, C, 1) attention weights."""
    x = x_ref[...].astype(jnp.float32)                 # (TB, C, L)
    mx, sm = _pooled_max_and_sum(x, length)            # (TB, C, 1) each
    snr = jnp.log(mx / sm) * _INV_LN10
    m = jnp.max(snr, axis=1, keepdims=True)            # softmax over channels
    e = jnp.exp(snr - m)
    out_ref[...] = (e / jnp.sum(e, axis=1, keepdims=True)).astype(out_ref.dtype)


def _pick_batch_tile(batch, row_f32_bytes, max_block_bytes):
    """Rows per grid step: as many as fit the f32 working-set budget, kept a
    multiple of 8 sublanes (or the full batch), with >= 2 grid steps for larger
    batches so both v7x TensorCores get work and DMA/compute overlap."""
    fit = max(1, max_block_bytes // max(row_f32_bytes, 1))
    if fit >= batch:
        if batch >= 16:                                # split anyway (megacore)
            half = -(-((batch + 1) // 2) // 8) * 8
            if half < batch:
                return half
        return batch                                   # tiny batch: single block
    tb = max(8, (fit // 8) * 8)
    return min(tb, batch)                              # full-dim blocks always legal


def snr_attention_forward(sig_fft, *, max_block_bytes=_DEFAULT_BLOCK_BYTES,
                          vmem_limit_bytes=_DEFAULT_VMEM_LIMIT):
    """sig_fft: (B, C, L) spectrum -> (B, C, 1) per-channel SNR attention."""
    B, C, L = sig_fft.shape
    compiler_params = pltpu.CompilerParams(
        dimension_semantics=("parallel",),             # batch tiles independent
        vmem_limit_bytes=vmem_limit_bytes,
    )

    if C <= _LANE_PACK_MAX_C:
        # Flatten channels onto the lane axis: dense sublane packing even for
        # C = 4; channel softmax stays in-kernel with channels on lanes.
        row_f32_bytes = C * L * 4
        tb = _pick_batch_tile(B, row_f32_bytes, max_block_bytes)
        grid = (pl.cdiv(B, tb),)
        kernel = functools.partial(_snr_kernel_lane_packed,
                                   num_channels=C, length=L)
        out = pl.pallas_call(
            kernel,
            out_shape=jax.ShapeDtypeStruct((B, C), sig_fft.dtype),
            grid=grid,
            in_specs=[pl.BlockSpec((tb, C * L), lambda i: (i, 0))],
            out_specs=pl.BlockSpec((tb, C), lambda i: (i, 0)),
            compiler_params=compiler_params,
        )(sig_fft.reshape(B, C * L))
        return out.reshape(B, C, 1)

    # Larger channel counts: keep channels on the sublane axis (dense once
    # C >= 8); avoids unrolling the kernel body over C.
    c_padded = -(-C // 8) * 8                          # sublane padding in VMEM
    row_f32_bytes = c_padded * L * 4
    tb = _pick_batch_tile(B, row_f32_bytes, max_block_bytes)
    grid = (pl.cdiv(B, tb),)
    kernel = functools.partial(_snr_kernel_channels_sublane, length=L)
    return pl.pallas_call(
        kernel,
        out_shape=jax.ShapeDtypeStruct((B, C, 1), sig_fft.dtype),
        grid=grid,
        in_specs=[pl.BlockSpec((tb, C, L), lambda i: (i, 0, 0))],
        out_specs=pl.BlockSpec((tb, C, 1), lambda i: (i, 0, 0)),
        compiler_params=compiler_params,
    )(sig_fft)


def snr_attention_reference(sig_fft):
    """Pure-JAX reference of the PyTorch forward."""
    x = sig_fft.astype(jnp.float32)
    xp = jnp.pad(x, ((0, 0), (0, 0), (0, 1)))                  # pad right by 1
    spec = 0.5 * (xp[:, :, :-1] + xp[:, :, 1:])                # k=2, s=1 avg pool
    snr = (jnp.max(spec, axis=-1, keepdims=True)
           / jnp.sum(spec, axis=-1, keepdims=True))
    snr = jnp.log(snr) / jnp.log(10.0)
    return jax.nn.softmax(snr, axis=1).astype(sig_fft.dtype)


if __name__ == "__main__":
    key = jax.random.PRNGKey(0)
    configs = [
        # (B, C, L, dtype, max_block_bytes)
        (2, 4, 128, jnp.float32, _DEFAULT_BLOCK_BYTES),   # tiny, lane-packed, 1 step
        (12, 4, 128, jnp.float32, 16 * 1024),             # multi-step + ragged cdiv grid
        (2, 72, 128, jnp.float32, _DEFAULT_BLOCK_BYTES),  # C > 64: channels-on-sublane path
        (2, 4, 128, jnp.bfloat16, _DEFAULT_BLOCK_BYTES),  # low-precision input
    ]
    for idx, (B, C, L, dtype, blk) in enumerate(configs):
        key, sub = jax.random.split(key)
        # A power/magnitude spectrum is non-negative; keep it strictly positive
        # so log(max/sum) is finite (same domain assumption as the PyTorch module).
        sig_fft = jax.random.uniform(sub, (B, C, L), jnp.float32,
                                     minval=0.05, maxval=1.0).astype(dtype)
        out = jax.block_until_ready(
            snr_attention_forward(sig_fft, max_block_bytes=blk))
        ref = snr_attention_reference(sig_fft)
        assert out.shape == (B, C, 1), (idx, out.shape)
        tol = 3e-5 if dtype == jnp.float32 else 5e-3
        assert jnp.allclose(out.astype(jnp.float32), ref.astype(jnp.float32),
                            atol=tol, rtol=tol), f"mismatch vs reference (config {idx})"
    print("KERNEL_OK")
</pallas_src>

<mosaic_0001>
module attributes {stable_mosaic.version = 11 : i64} {
  func.func @_snr_kernel_lane_packed(%arg0: i32, %arg1: memref<2x512xf32, #tpu.memory_space<vmem>>, %arg2: memref<2x4xf32, #tpu.memory_space<vmem>>) attributes {dimension_semantics = [#tpu.dimension_semantics<parallel>], iteration_bounds = array<i64: 1>, scalar_prefetch = 0 : i64, scratch_operands = 0 : i64, tpu.core_type = #tpu.core_type<tc>, window_params = [{transform_indices = @transform_0, window_bounds = array<i64: 2, 512>}, {transform_indices = @transform_1, window_bounds = array<i64: 2, 4>}]} {
    %c0 = arith.constant 0 : index
    %c0_0 = arith.constant 0 : index
    %0 = vector.load %arg1[%c0, %c0_0] : memref<2x512xf32, #tpu.memory_space<vmem>>, vector<2x128xf32>
    %1 = tpu.iota {dimensions = array<i32: 1>} : vector<2x128xi32>
    %c127_i32 = arith.constant 127 : i32
    %2 = vector.broadcast %c127_i32 : i32 to vector<2x128xi32>
    %3 = arith.cmpi eq, %1, %2 : vector<2x128xi32>
    %c127_i32_1 = arith.constant 127 : i32
    %4 = tpu.dynamic_rotate %0 by %c127_i32_1 dim 1 : vector<2x128xf32>, i32 -> vector<2x128xf32>
    %cst = arith.constant 0.000000e+00 : f32
    %5 = vector.broadcast %cst : f32 to vector<2x128xf32>
    %6 = arith.select %3, %5, %4 : vector<2x128xi1>, vector<2x128xf32>
    %7 = arith.addf %0, %6 : vector<2x128xf32>
    %cst_2 = arith.constant dense<0xFF800000> : vector<2xf32>
    %8 = vector.multi_reduction <maximumf>, %7, %cst_2 [1] : vector<2x128xf32> to vector<2xf32>
    %9 = vector.shape_cast %8 : vector<2xf32> to vector<2x1xf32>
    %cst_3 = arith.constant 5.000000e-01 : f32
    %10 = vector.broadcast %cst_3 : f32 to vector<2x1xf32>
    %11 = arith.mulf %10, %9 : vector<2x1xf32>
    %cst_4 = arith.constant dense<0.000000e+00> : vector<2xf32>
    %12 = vector.multi_reduction <add>, %0, %cst_4 [1] : vector<2x128xf32> to vector<2xf32>
    %13 = vector.shape_cast %12 : vector<2xf32> to vector<2x1xf32>
    %14 = vector.extract_strided_slice %0 {offsets = [0, 0], sizes = [2, 1], strides = [1, 1]} : vector<2x128xf32> to vector<2x1xf32>
    %cst_5 = arith.constant 5.000000e-01 : f32
    %15 = vector.broadcast %cst_5 : f32 to vector<2x1xf32>
    %16 = arith.mulf %15, %14 : vector<2x1xf32>
    %17 = arith.subf %13, %16 : vector<2x1xf32>
    %18 = arith.divf %11, %17 : vector<2x1xf32>
    %19 = math.log %18 : vector<2x1xf32>
    %c0_6 = arith.constant 0 : index
    %c128 = arith.constant 128 : index
    %20 = vector.load %arg1[%c0_6, %c128] : memref<2x512xf32, #tpu.memory_space<vmem>>, vector<2x128xf32>
    %21 = tpu.iota {dimensions = array<i32: 1>} : vector<2x128xi32>
    %c127_i32_7 = arith.constant 127 : i32
    %22 = vector.broadcast %c127_i32_7 : i32 to vector<2x128xi32>
    %23 = arith.cmpi eq, %21, %22 : vector<2x128xi32>
    %c127_i32_8 = arith.constant 127 : i32
    %24 = tpu.dynamic_rotate %20 by %c127_i32_8 dim 1 : vector<2x128xf32>, i32 -> vector<2x128xf32>
    %cst_9 = arith.constant 0.000000e+00 : f32
    %25 = vector.broadcast %cst_9 : f32 to vector<2x128xf32>
    %26 = arith.select %23, %25, %24 : vector<2x128xi1>, vector<2x128xf32>
    %27 = arith.addf %20, %26 : vector<2x128xf32>
    %cst_10 = arith.constant dense<0xFF800000> : vector<2xf32>
    %28 = vector.multi_reduction <maximumf>, %27, %cst_10 [1] : vector<2x128xf32> to vector<2xf32>
    %29 = vector.shape_cast %28 : vector<2xf32> to vector<2x1xf32>
    %cst_11 = arith.constant 5.000000e-01 : f32
    %30 = vector.broadcast %cst_11 : f32 to vector<2x1xf32>
    %31 = arith.mulf %30, %29 : vector<2x1xf32>
    %cst_12 = arith.constant dense<0.000000e+00> : vector<2xf32>
    %32 = vector.multi_reduction <add>, %20, %cst_12 [1] : vector<2x128xf32> to vector<2xf32>
    %33 = vector.shape_cast %32 : vector<2xf32> to vector<2x1xf32>
    %34 = vector.extract_strided_slice %20 {offsets = [0, 0], sizes = [2, 1], strides = [1, 1]} : vector<2x128xf32> to vector<2x1xf32>
    %cst_13 = arith.constant 5.000000e-01 : f32
    %35 = vector.broadcast %cst_13 : f32 to vector<2x1xf32>
    %36 = arith.mulf %35, %34 : vector<2x1xf32>
    %37 = arith.subf %33, %36 : vector<2x1xf32>
    %38 = arith.divf %31, %37 : vector<2x1xf32>
    %39 = math.log %38 : vector<2x1xf32>
    %c0_14 = arith.constant 0 : index
    %c256 = arith.constant 256 : index
    %40 = vector.load %arg1[%c0_14, %c256] : memref<2x512xf32, #tpu.memory_space<vmem>>, vector<2x128xf32>
    %41 = tpu.iota {dimensions = array<i32: 1>} : vector<2x128xi32>
    %c127_i32_15 = arith.constant 127 : i32
    %42 = vector.broadcast %c127_i32_15 : i32 to vector<2x128xi32>
    %43 = arith.cmpi eq, %41, %42 : vector<2x128xi32>
    %c127_i32_16 = arith.constant 127 : i32
    %44 = tpu.dynamic_rotate %40 by %c127_i32_16 dim 1 : vector<2x128xf32>, i32 -> vector<2x128xf32>
    %cst_17 = arith.constant 0.000000e+00 : f32
    %45 = vector.broadcast %cst_17 : f32 to vector<2x128xf32>
    %46 = arith.select %43, %45, %44 : vector<2x128xi1>, vector<2x128xf32>
    %47 = arith.addf %40, %46 : vector<2x128xf32>
    %cst_18 = arith.constant dense<0xFF800000> : vector<2xf32>
    %48 = vector.multi_reduction <maximumf>, %47, %cst_18 [1] : vector<2x128xf32> to vector<2xf32>
    %49 = vector.shape_cast %48 : vector<2xf32> to vector<2x1xf32>
    %cst_19 = arith.constant 5.000000e-01 : f32
    %50 = vector.broadcast %cst_19 : f32 to vector<2x1xf32>
    %51 = arith.mulf %50, %49 : vector<2x1xf32>
    %cst_20 = arith.constant dense<0.000000e+00> : vector<2xf32>
    %52 = vector.multi_reduction <add>, %40, %cst_20 [1] : vector<2x128xf32> to vector<2xf32>
    %53 = vector.shape_cast %52 : vector<2xf32> to vector<2x1xf32>
    %54 = vector.extract_strided_slice %40 {offsets = [0, 0], sizes = [2, 1], strides = [1, 1]} : vector<2x128xf32> to vector<2x1xf32>
    %cst_21 = arith.constant 5.000000e-01 : f32
    %55 = vector.broadcast %cst_21 : f32 to vector<2x1xf32>
    %56 = arith.mulf %55, %54 : vector<2x1xf32>
    %57 = arith.subf %53, %56 : vector<2x1xf32>
    %58 = arith.divf %51, %57 : vector<2x1xf32>
    %59 = math.log %58 : vector<2x1xf32>
    %c0_22 = arith.constant 0 : index
    %c384 = arith.constant 384 : index
    %60 = vector.load %arg1[%c0_22, %c384] : memref<2x512xf32, #tpu.memory_space<vmem>>, vector<2x128xf32>
    %61 = tpu.iota {dimensions = array<i32: 1>} : vector<2x128xi32>
    %c127_i32_23 = arith.constant 127 : i32
    %62 = vector.broadcast %c127_i32_23 : i32 to vector<2x128xi32>
    %63 = arith.cmpi eq, %61, %62 : vector<2x128xi32>
    %c127_i32_24 = arith.constant 127 : i32
    %64 = tpu.dynamic_rotate %60 by %c127_i32_24 dim 1 : vector<2x128xf32>, i32 -> vector<2x128xf32>
    %cst_25 = arith.constant 0.000000e+00 : f32
    %65 = vector.broadcast %cst_25 : f32 to vector<2x128xf32>
    %66 = arith.select %63, %65, %64 : vector<2x128xi1>, vector<2x128xf32>
    %67 = arith.addf %60, %66 : vector<2x128xf32>
    %cst_26 = arith.constant dense<0xFF800000> : vector<2xf32>
    %68 = vector.multi_reduction <maximumf>, %67, %cst_26 [1] : vector<2x128xf32> to vector<2xf32>
    %69 = vector.shape_cast %68 : vector<2xf32> to vector<2x1xf32>
    %cst_27 = arith.constant 5.000000e-01 : f32
    %70 = vector.broadcast %cst_27 : f32 to vector<2x1xf32>
    %71 = arith.mulf %70, %69 : vector<2x1xf32>
    %cst_28 = arith.constant dense<0.000000e+00> : vector<2xf32>
    %72 = vector.multi_reduction <add>, %60, %cst_28 [1] : vector<2x128xf32> to vector<2xf32>
    %73 = vector.shape_cast %72 : vector<2xf32> to vector<2x1xf32>
    %74 = vector.extract_strided_slice %60 {offsets = [0, 0], sizes = [2, 1], strides = [1, 1]} : vector<2x128xf32> to vector<2x1xf32>
    %cst_29 = arith.constant 5.000000e-01 : f32
    %75 = vector.broadcast %cst_29 : f32 to vector<2x1xf32>
    %76 = arith.mulf %75, %74 : vector<2x1xf32>
    %77 = arith.subf %73, %76 : vector<2x1xf32>
    %78 = arith.divf %71, %77 : vector<2x1xf32>
    %79 = math.log %78 : vector<2x1xf32>
    %80 = tpu.concatenate %19, %39, %59, %79 in 1 : vector<2x1xf32>, vector<2x1xf32>, vector<2x1xf32>, vector<2x1xf32> -> vector<2x4xf32>
    %cst_30 = arith.constant 0.434294492 : f32
    %81 = vector.broadcast %cst_30 : f32 to vector<2x4xf32>
    %82 = arith.mulf %80, %81 : vector<2x4xf32>
    %cst_31 = arith.constant dense<0xFF800000> : vector<2xf32>
    %83 = vector.multi_reduction <maximumf>, %82, %cst_31 [1] : vector<2x4xf32> to vector<2xf32>
    %84 = vector.shape_cast %83 : vector<2xf32> to vector<2x1xf32>
    %85 = vector.broadcast %84 : vector<2x1xf32> to vector<2x4xf32>
    %86 = arith.subf %82, %85 : vector<2x4xf32>
    %87 = math.exp %86 : vector<2x4xf32>
    %cst_32 = arith.constant dense<0.000000e+00> : vector<2xf32>
    %88 = vector.multi_reduction <add>, %87, %cst_32 [1] : vector<2x4xf32> to vector<2xf32>
    %89 = vector.shape_cast %88 : vector<2xf32> to vector<2x1xf32>
    %90 = vector.broadcast %89 : vector<2x1xf32> to vector<2x4xf32>
    %91 = arith.divf %87, %90 : vector<2x4xf32>
    %c0_33 = arith.constant 0 : index
    %c0_34 = arith.constant 0 : index
    %92 = vector.load %arg2[%c0_33, %c0_34] : memref<2x4xf32, #tpu.memory_space<vmem>>, vector<2x4xf32>
    tpu.vector_store %arg2[%c0_33, %c0_34], %91 {strides = array<i32>} : memref<2x4xf32, #tpu.memory_space<vmem>>, vector<2x4xf32>,
    return
  }
  func.func @transform_0(%arg0: i32) -> (i32, i32) {
    %c0_i32 = arith.constant 0 : i32
    %c0_i32_0 = arith.constant 0 : i32
    return %arg0, %c0_i32 : i32, i32
  }
  func.func @transform_1(%arg0: i32) -> (i32, i32) {
    %c0_i32 = arith.constant 0 : i32
    %c0_i32_0 = arith.constant 0 : i32
    return %arg0, %c0_i32 : i32, i32
  }
}

</mosaic_0001>

<bundles_post_ra>
// kernel: tpu_custom_call.1
= control target key start
LH: loop header
LB: loop body
LE: loop exit
PB: predicated region body
PF: predicated region fallthrough
CT: control target
= control target key end

     0   :  { %6 = vsyncpa [#allocation3], 0  ;;  %s279_s0 = inlined_call_operand.hbm [shape: f32[2,512], index: 0, kind: input, shape index: {}]   ;;  %s280_s1 = inlined_call_operand.hbm [shape: f32[2,4], index: 1, kind: output, shape index: {}]  }
   0x1   :  { %7 = vsyncpa [#allocation4], 0  ;;  %s218_s6 = smov [#allocation2]   ;;  %s170_s10 = scalar_lea.hbm %s279_s0, 128 }
   0x2   :  { %s14_s7 = sshll.u32 %s218_s6, 4  ;;  %p171_p0 = scmp.ne.s32.totalorder %s279_s0, %s170_s10  ;;  %s15_s7 = int_to_ptr.vmem [resolvable:$true] %s14_s7 }
   0x3   :  { %p174_p1 = scmp.lt.u32.totalorder %s170_s10, %s279_s0 }
   0x5   :  { %p176_p2 = pnand %p174_p1, %p171_p0 }
   0x7   :  { %179 = shalt.err (!%p176_p2)
}
   0x8   :  { %s180_s15 = scalar_lea.vmem %s15_s7, 128  ;;  %p185_p4 = scmp.lt.s32.totalorder %s15_s7, %s15_s7 }
   0x9   :  { %p181_p3 = scmp.ne.s32.totalorder %s15_s7, %s180_s15  ;;  %p186_p5 = scmp.lt.s32.totalorder %s180_s15, %s180_s15 }
   0xb   :  { %p187_p6 = por %p186_p5, %p185_p4 }
   0xd   :  { %p188_p7 = pnand %p187_p6, %p181_p3 }
   0xf   :  { %191 = shalt.err (!%p188_p7)
}
  0x10   :  { %17 = dma.hbm_to_vmem [thread:$0]  %s279_s0, 128, %s15_s7, [#allocation3]  }
  0x11   :  { %214 = dma.done.wait [#allocation3], 128  }
  0x12   :  { %215 = vsyncadd [#allocation3], 4294967168  ;;  %v43_v0 = vld [vmem:[#allocation2 + $0x2] sm:$0x3]  ;;  %v79_v1 = vld [vmem:[#allocation2 + $0x6] sm:$0x3]  ;;  %v22_v7 = vlaneseq }
  0x13   :  { %s219_s18 = smov 127   ;;  %v61_v2 = vld [vmem:[#allocation2 + $0x4] sm:$0x3]  ;;  %vm29_vm0 = vcmask 1041408   ;;  %v249_v6 = vld [vmem:[#allocation2] sm:$0x3] }
  0x14   :  { %44 = vrot.lane.b32.xlu0 %v43_v0, %s219_s18  ;;  %80 = vrot.lane.b32.xlu1 %v79_v1, %s219_s18  ;;  %v70_v3 = vsel %vm29_vm0, %v61_v2, 0.0  ;;  %v52_v4 = vsel %vm29_vm0, %v43_v0, 0.0  ;;  %v88_v5 = vsel %vm29_vm0, %v79_v1, 0.0  ;;  %v23_v8 = vand.u32 127, %v22_v7  ;;  %s220_s0 = smov 1   ;;  %s221_s19 = smov 2  }
  0x15   :  { %v34_v21 = vsel %vm29_vm0, %v249_v6, 0.0  ;;  %v55_v27 = vmul.f32 0.5, %v43_v0  ;;  %v73_v29 = vmul.f32 0.5, %v61_v2  ;;  %v91_v32 = vmul.f32 0.5, %v79_v1  ;;  %s222_s20 = smov 3   ;;  %s223_s21 = smov [#allocation5]  }
  0x16   :  { %vm24_vm1 = vcmp.eq.s32.totalorder %v23_v8, 127  ;;  %v37_v53 = vmul.f32 0.5, %v249_v6  ;;  %vm109_vm2 = vcmask 7168   ;;  %vm111_vm3 = vcmask 15360   ;;  %s135_s22 = sshll.u32 %s223_s21, 4  ;;  %s136_s22 = int_to_ptr.vmem [resolvable:$true] %s135_s22 }
  0x17   :  { %vm113_vm4 = vcmask 23552   ;;  %vm116_vm5 = vcmask 25600   ;;  %s192_s23 = scalar_lea.vmem %s136_s22, 32  ;;  %p197_p9 = scmp.lt.s32.totalorder %s136_s22, %s136_s22 }
  0x18   :  { %62 = vrot.lane.b32.xlu0 %v61_v2, %s219_s18  ;;  %p193_p8 = scmp.ne.s32.totalorder %s136_s22, %s192_s23  ;;  %p198_p10 = scmp.lt.s32.totalorder %s192_s23, %s192_s23 }
  0x1a   :  { %p199_p11 = por %p198_p10, %p197_p9 }
  0x1c   :  { %p200_p12 = pnand %p199_p11, %p193_p8 }
  0x37   :  { %71 = vadd.xlane.f32.xlu0 %v70_v3 }
  0x38   :  { %53 = vadd.xlane.f32.xlu1 %v52_v4 }
  0x3b   :  { %89 = vadd.xlane.f32.xlu0 %v88_v5 }
  0x49   :  { %25 = vrot.lane.b32.xlu1 %v249_v6, %s219_s18 }
  0x86   :  { %v45_v9 = vpop.permute.xlu0 %44  ;;  %v81_v10 = vpop.permute.xlu1 %80 }
  0x87   :  { %v46_v11 = vsel %vm24_vm1, 0.0, %v45_v9  ;;  %v82_v13 = vsel %vm24_vm1, 0.0, %v81_v10 }
  0x88   :  { %v47_v12 = vadd.f32 %v46_v11, %v43_v0  ;;  %v83_v18 = vadd.f32 %v82_v13, %v79_v1 }
  0x8a   :  { %v63_v14 = vpop.permute.xlu0 %62  ;;  %v48_v15 = vsel %vm29_vm0, %v47_v12, -inf  ;;  %v84_v20 = vsel %vm29_vm0, %v83_v18, -inf }
  0x8b   :  { %v64_v16 = vsel %vm24_vm1, 0.0, %v63_v14  ;;  %49 = vmax.xlane.f32.xlu0 %v48_v15 }
  0x8c   :  { %v65_v17 = vadd.f32 %v64_v16, %v61_v2 }
  0x8e   :  { %v66_v19 = vsel %vm29_vm0, %v65_v17, -inf }
  0x8f   :  { %67 = vmax.xlane.f32.xlu0 %v66_v19 }
  0x93   :  { %85 = vmax.xlane.f32.xlu0 %v84_v20 }
  0x97   :  { %35 = vadd.xlane.f32.xlu0 %v34_v21 }
  0xc4   :  { %v72_v28 = vpop.xlane.xlu0 %71 }
  0xc5   :  { %v54_v22 = vpop.xlane.xlu1 %53  ;;  %v74_v31 = vsub.f32 %v72_v28, %v73_v29 }
  0xc6   :  { %v56_v30 = vsub.f32 %v54_v22, %v55_v27 }
  0xc8   :  { %v90_v33 = vpop.xlane.xlu0 %89  ;;  %150 = vrcp.f32 %v56_v30 }
  0xc9   :  { %v26_v23 = vpop.permute.xlu1 %25  ;;  %152 = vrcp.f32 %v74_v31  ;;  %v92_v34 = vsub.f32 %v90_v33, %v91_v32 }
  0xca   :  { %v27_v24 = vsel %vm24_vm1, 0.0, %v26_v23 }
  0xcb   :  { %v28_v25 = vadd.f32 %v27_v24, %v249_v6  ;;  %154 = vrcp.f32 %v92_v34 }
  0xcd   :  { %v30_v26 = vsel %vm29_vm0, %v28_v25, -inf }
  0xce   :  { %31 = vmax.xlane.f32.xlu1 %v30_v26 }
  0xd2   :  { %v151_v37 = vpop.eup %150 }
  0xd3   :  { %v153_v39 = vpop.eup %152 }
  0xd5   :  { %v155_v43 = vpop.eup %154 }
 0x118   :  { %v50_v35 = vpop.xlane.xlu0 %49 }
 0x119   :  { %v51_v36 = vmul.f32 0.5, %v50_v35 }
 0x11b   :  { %v58_v38 = vmul.f32 %v151_v37, %v51_v36 }
 0x11c   :  { %v68_v40 = vpop.xlane.xlu0 %67 }
 0x11d   :  { %156 = vlog2.f32 %v58_v38  ;;  %v69_v41 = vmul.f32 0.5, %v68_v40 }
 0x11f   :  { %v76_v42 = vmul.f32 %v153_v39, %v69_v41 }
 0x120   :  { %v86_v44 = vpop.xlane.xlu0 %85 }
 0x121   :  { %158 = vlog2.f32 %v76_v42  ;;  %v87_v45 = vmul.f32 0.5, %v86_v44 }
 0x123   :  { %v94_v46 = vmul.f32 %v155_v43, %v87_v45 }
 0x124   :  { %v36_v54 = vpop.xlane.xlu0 %35 }
 0x125   :  { %160 = vlog2.f32 %v94_v46  ;;  %v38_v55 = vsub.f32 %v36_v54, %v37_v53 }
 0x127   :  { %v157_v47 = vpop.eup %156  ;;  %162 = vrcp.f32 %v38_v55 }
 0x128   :  { %v60_v48 = vmul.f32 0.6931472, %v157_v47 }
 0x12a   :  { %98 = vrot.lane.b32.xlu0 %v60_v48, %s220_s0 }
 0x12b   :  { %v159_v49 = vpop.eup %158 }
 0x12c   :  { %v78_v50 = vmul.f32 0.6931472, %v159_v49 }
 0x12e   :  { %102 = vrot.lane.b32.xlu0 %v78_v50, %s221_s19 }
 0x12f   :  { %v161_v51 = vpop.eup %160 }
 0x130   :  { %v96_v52 = vmul.f32 0.6931472, %v161_v51 }
 0x131   :  { %v163_v58 = vpop.eup %162 }
 0x132   :  { %106 = vrot.lane.b32.xlu0 %v96_v52, %s222_s20 }
 0x15b   :  { %v32_v56 = vpop.xlane.xlu1 %31 }
 0x15c   :  { %v33_v57 = vmul.f32 0.5, %v32_v56 }
 0x15e   :  { %v40_v59 = vmul.f32 %v163_v58, %v33_v57 }
 0x160   :  { %164 = vlog2.f32 %v40_v59 }
 0x16a   :  { %v165_v60 = vpop.eup %164 }
 0x16b   :  { %v42_v62 = vmul.f32 0.6931472, %v165_v60 }
 0x19c   :  { %v99_v61 = vpop.permute.xlu0 %98 }
 0x19d   :  { %v110_v0 = vsel %vm109_vm2, %v42_v62, %v99_v61 }
 0x1a0   :  { %v103_v63 = vpop.permute.xlu0 %102 }
 0x1a1   :  { %v112_v1 = vsel %vm111_vm3, %v110_v0, %v103_v63 }
 0x1a4   :  { %v107_v2 = vpop.permute.xlu0 %106 }
 0x1a5   :  { %v114_v3 = vsel %vm113_vm4, %v112_v1, %v107_v2 }
 0x1a6   :  { %v115_v4 = vmul.f32 0.4342945, %v114_v3 }
 0x1a8   :  { %v117_v5 = vsel %vm116_vm5, %v115_v4, -inf }
 0x1a9   :  { %118 = vmax.xlane.f32.xlu0 %v117_v5 }
 0x236   :  { %v119_v6 = vpop.xlane.xlu0 %118 }
 0x237   :  { %v120_v7 = vsub.f32 %v115_v4, %v119_v6 }
 0x239   :  { %v121_v8 = vmul.f32 1.442695, %v120_v7 }
 0x23b   :  { %166 = vpow2.f32 %v121_v8 }
 0x245   :  { %v167_v9 = vpop.eup %166 }
 0x246   :  { %v123_v10 = vsel %vm116_vm5, %v167_v9, 0.0 }
 0x247   :  { %124 = vadd.xlane.f32.xlu1 %v123_v10 }
 0x2d4   :  { %v125_v11 = vpop.xlane.xlu1 %124 }
 0x2d5   :  { %168 = vrcp.f32 %v125_v11 }
 0x2df   :  { %v169_v12 = vpop.eup %168 }
 0x2e0   :  { %v127_v13 = vmul.f32 %v169_v12, %v167_v9 }
 0x2e2   :  { %128 = vst.msk [vmem:[#allocation5] sm:$0x3] %vm116_vm5, %v127_v13 }
 0x2e3   :  { %203 = shalt.err (!%p200_p12)
}
 0x2e4   :  { %s204_s26 = scalar_lea.hbm %s280_s1, 32 }
 0x2e5   :  { %p205_p13 = scmp.ne.s32.totalorder %s280_s1, %s204_s26  ;;  %p208_p0 = scmp.lt.u32.totalorder %s204_s26, %s280_s1 }
 0x2e7   :  { %p210_p1 = pnand %p208_p0, %p205_p13 }
 0x2e9   :  { %213 = shalt.err (!%p210_p1)
}
 0x2ea   :  { %138 = dma.vmem_to_hbm [thread:$0]  %s136_s22, 32, %s280_s1, [#allocation4]  }
 0x2eb   :  { %216 = dma.done.wait [#allocation4], 32  }
 0x2ec   :  { %217 = vsyncadd [#allocation4], 4294967264 }
 0x2ed   :  { %142 = vsyncpa [#allocation3], 1 }
 0x2ee   :  { %143 = vsyncpa [#allocation4], 1 }

</bundles_post_ra>
